<compile_context>
chip_gen: v7x
topology: tpu7x:2x2x1
jax: 0.10.0
libtpu: 0.0.40
codegen_flags: <defaults>
</compile_context>

<pallas_src>
import jax
import jax.numpy as jnp
from jax.experimental import pallas as pl
from jax.experimental.pallas import tpu as pltpu


# ----------------------------------------------------------------------------
# Layout helper: flatten N elements into a lane-dense (rows, cols) slab that
# exactly covers the data (no padding, no wrapper-side slicing).
# ----------------------------------------------------------------------------
def _lane_dense_layout(n):
    """Return (rows, cols, block_rows) for a copy-free lane-dense 2D layout."""
    for cols in (1024, 512, 256, 128):
        if n % cols == 0:
            rows = n // cols
            # Cap the per-stream tile at ~1 MiB so 6 streams x 2 pipeline
            # buffers stay under every generation's default scoped-VMEM limit.
            br_max = max(8, (1 << 20) // (cols * 4))
            for br in (512, 256, 128, 64, 32, 16, 8):
                if br <= br_max and rows % br == 0:
                    return rows, cols, br
            # rows not divisible by any multiple-of-8 candidate: use the full
            # row extent as a single block (always a legal block shape).
            return rows, cols, rows
    # Tiny / irregular sizes: one block covering the whole (1, n) array.
    return 1, n, 1


# ----------------------------------------------------------------------------
# Kernel: DiagonalGaussianDistribution construction + reparameterized sample.
#   logvar_out = clamp(logvar_raw, -30, 20)
#   std_out    = exp(0.5 * logvar_out)          (single EUP exp per element)
#   z_out      = mean + std_out * eps           (VALU FMA)
# ----------------------------------------------------------------------------
def _posterior_sample_kernel(mean_ref, logvar_ref, eps_ref,
                             logvar_out, std_out, z_out):
    lv = jnp.clip(logvar_ref[...], -30.0, 20.0)
    std = jnp.exp(0.5 * lv)
    logvar_out[...] = lv
    std_out[...] = std
    z_out[...] = mean_ref[...] + std * eps_ref[...]


def _posterior_sample(mean, logvar_raw, eps):
    """Run the fused posterior kernel; all args share one NCHW latent shape."""
    shape = mean.shape
    n = int(mean.size)
    rows, cols, br = _lane_dense_layout(n)

    def to2d(a):
        return a.reshape(rows, cols)

    spec = pl.BlockSpec((br, cols), lambda i: (i, 0))
    out_sh = jax.ShapeDtypeStruct((rows, cols), jnp.float32)

    logvar2d, std2d, z2d = pl.pallas_call(
        _posterior_sample_kernel,
        out_shape=(out_sh, out_sh, out_sh),
        grid=(rows // br,),
        in_specs=[spec, spec, spec],
        out_specs=(spec, spec, spec),
        compiler_params=pltpu.CompilerParams(
            dimension_semantics=("parallel",)),
    )(to2d(mean), to2d(logvar_raw), to2d(eps))

    def back(a):
        return a.reshape(shape)

    return back(logvar2d), back(std2d), back(z2d)


# ----------------------------------------------------------------------------
# DummyVAE wrapper (no learnable parameters).
# ----------------------------------------------------------------------------
class DummyVAEPallas:
    """JAX/Pallas re-implementation of the parameter-free DummyVAE."""

    def __init__(self, embed_dim, ch_mult=None, use_variational=True):
        self.embed_dim = embed_dim
        self.use_variational = use_variational

    def forward(self, key, x, return_recon=True):
        B, C, H, W = x.shape
        if self.embed_dim == 4:
            h, w = H // 8, W // 8
            moment_ch, scale = 8, 8
        else:
            h, w = H // 16, W // 16
            moment_ch, scale = 64, 16
        c_lat = moment_ch // 2

        k_mom, k_eps, k_rec = jax.random.split(key, 3)

        # encode(): random "moments" (mirrors torch.randn in the reference).
        moments = jax.random.normal(k_mom, (B, moment_ch, h, w), jnp.float32)
        # sample(): reparameterization noise.
        eps = jax.random.normal(k_eps, (B, c_lat, h, w), jnp.float32)

        mean = moments[:, :c_lat]
        logvar_raw = moments[:, c_lat:]

        # Posterior math + sampling fused in one Pallas kernel.
        logvar, std, z = _posterior_sample(mean, logvar_raw, eps)

        posterior = {
            "mean": mean,            # input slice — not re-emitted by the kernel
            "logvar": logvar,        # clamped inside the kernel
            "std": std,
            "var": std * std,        # == exp(logvar); recomputed, not streamed
        }

        recon = None
        if return_recon:
            # decode(): pure random tensor with zero arithmetic — generated
            # directly (no Pallas compute to express).
            recon = jax.random.normal(
                k_rec, (B, 3, h * scale, w * scale), jnp.float32)
        return posterior, z, recon


if __name__ == "__main__":
    key = jax.random.PRNGKey(0)
    k_x, k_fwd = jax.random.split(key)

    # Input image in NCHW, consistent with the PyTorch module.
    B, C, H, W = 2, 3, 16, 16
    x = jax.random.normal(k_x, (B, C, H, W), jnp.float32)

    vae = DummyVAEPallas(embed_dim=4, ch_mult=(1, 2, 4), use_variational=True)
    posterior, z, recon = vae.forward(k_fwd, x, return_recon=True)
    jax.block_until_ready((posterior, z, recon))

    # Shape checks mirroring the PyTorch semantics (embed_dim=4 -> /8 latent).
    assert z.shape == (B, 4, H // 8, W // 8)
    assert posterior["mean"].shape == z.shape
    assert posterior["logvar"].shape == z.shape
    assert posterior["std"].shape == z.shape
    assert posterior["var"].shape == z.shape
    assert recon.shape == (B, 3, H, W)

    # Semantic checks of the distribution math done inside the kernel.
    lv = posterior["logvar"]
    assert bool(jnp.all(lv >= -30.0)) and bool(jnp.all(lv <= 20.0))
    assert jnp.allclose(posterior["std"], jnp.exp(0.5 * lv),
                        rtol=1e-5, atol=1e-6)
    assert jnp.allclose(posterior["var"], jnp.exp(lv), rtol=1e-5, atol=1e-6)
    # z must equal mean + std * eps for the eps actually drawn in forward().
    _, k_eps_chk, _ = jax.random.split(jax.random.split(key)[1], 3)
    eps_chk = jax.random.normal(k_eps_chk, z.shape, jnp.float32)
    assert jnp.allclose(z, posterior["mean"] + posterior["std"] * eps_chk,
                        rtol=1e-5, atol=1e-6)
    assert bool(jnp.all(jnp.isfinite(z)))
    assert bool(jnp.all(jnp.isfinite(recon)))
    assert float(jnp.std(posterior["mean"])) > 0.1
    assert float(jnp.std(recon)) > 0.1

    print("KERNEL_OK")
</pallas_src>

<mosaic_0001>
module attributes {stable_mosaic.version = 11 : i64} {
  func.func @_posterior_sample_kernel(%arg0: i32, %arg1: memref<1x32xf32, #tpu.memory_space<vmem>>, %arg2: memref<1x32xf32, #tpu.memory_space<vmem>>, %arg3: memref<1x32xf32, #tpu.memory_space<vmem>>, %arg4: memref<1x32xf32, #tpu.memory_space<vmem>>, %arg5: memref<1x32xf32, #tpu.memory_space<vmem>>, %arg6: memref<1x32xf32, #tpu.memory_space<vmem>>) attributes {dimension_semantics = [#tpu.dimension_semantics<parallel>], iteration_bounds = array<i64: 1>, scalar_prefetch = 0 : i64, scratch_operands = 0 : i64, tpu.core_type = #tpu.core_type<tc>, window_params = [{transform_indices = @transform_0, window_bounds = array<i64: 1, 32>}, {transform_indices = @transform_1, window_bounds = array<i64: 1, 32>}, {transform_indices = @transform_2, window_bounds = array<i64: 1, 32>}, {transform_indices = @transform_3, window_bounds = array<i64: 1, 32>}, {transform_indices = @transform_4, window_bounds = array<i64: 1, 32>}, {transform_indices = @transform_5, window_bounds = array<i64: 1, 32>}]} {
    %c0 = arith.constant 0 : index
    %c0_0 = arith.constant 0 : index
    %0 = vector.load %arg2[%c0, %c0_0] : memref<1x32xf32, #tpu.memory_space<vmem>>, vector<1x32xf32>
    %cst = arith.constant -3.000000e+01 : f32
    %cst_1 = arith.constant 2.000000e+01 : f32
    %1 = vector.broadcast %cst : f32 to vector<1x32xf32>
    %2 = arith.maximumf %1, %0 : vector<1x32xf32>
    %3 = vector.broadcast %cst_1 : f32 to vector<1x32xf32>
    %4 = arith.minimumf %3, %2 : vector<1x32xf32>
    %cst_2 = arith.constant 5.000000e-01 : f32
    %5 = vector.broadcast %cst_2 : f32 to vector<1x32xf32>
    %6 = arith.mulf %5, %4 : vector<1x32xf32>
    %7 = math.exp %6 : vector<1x32xf32>
    %c0_3 = arith.constant 0 : index
    %c0_4 = arith.constant 0 : index
    %8 = vector.load %arg4[%c0_3, %c0_4] : memref<1x32xf32, #tpu.memory_space<vmem>>, vector<1x32xf32>
    tpu.vector_store %arg4[%c0_3, %c0_4], %4 {strides = array<i32>} : memref<1x32xf32, #tpu.memory_space<vmem>>, vector<1x32xf32>,
    %c0_5 = arith.constant 0 : index
    %c0_6 = arith.constant 0 : index
    %9 = vector.load %arg5[%c0_5, %c0_6] : memref<1x32xf32, #tpu.memory_space<vmem>>, vector<1x32xf32>
    tpu.vector_store %arg5[%c0_5, %c0_6], %7 {strides = array<i32>} : memref<1x32xf32, #tpu.memory_space<vmem>>, vector<1x32xf32>,
    %c0_7 = arith.constant 0 : index
    %c0_8 = arith.constant 0 : index
    %10 = vector.load %arg1[%c0_7, %c0_8] : memref<1x32xf32, #tpu.memory_space<vmem>>, vector<1x32xf32>
    %c0_9 = arith.constant 0 : index
    %c0_10 = arith.constant 0 : index
    %11 = vector.load %arg3[%c0_9, %c0_10] : memref<1x32xf32, #tpu.memory_space<vmem>>, vector<1x32xf32>
    %12 = arith.mulf %7, %11 : vector<1x32xf32>
    %13 = arith.addf %10, %12 : vector<1x32xf32>
    %c0_11 = arith.constant 0 : index
    %c0_12 = arith.constant 0 : index
    %14 = vector.load %arg6[%c0_11, %c0_12] : memref<1x32xf32, #tpu.memory_space<vmem>>, vector<1x32xf32>
    tpu.vector_store %arg6[%c0_11, %c0_12], %13 {strides = array<i32>} : memref<1x32xf32, #tpu.memory_space<vmem>>, vector<1x32xf32>,
    return
  }
  func.func @transform_0(%arg0: i32) -> (i32, i32) {
    %c0_i32 = arith.constant 0 : i32
    %c0_i32_0 = arith.constant 0 : i32
    return %arg0, %c0_i32 : i32, i32
  }
  func.func @transform_1(%arg0: i32) -> (i32, i32) {
    %c0_i32 = arith.constant 0 : i32
    %c0_i32_0 = arith.constant 0 : i32
    return %arg0, %c0_i32 : i32, i32
  }
  func.func @transform_2(%arg0: i32) -> (i32, i32) {
    %c0_i32 = arith.constant 0 : i32
    %c0_i32_0 = arith.constant 0 : i32
    return %arg0, %c0_i32 : i32, i32
  }
  func.func @transform_3(%arg0: i32) -> (i32, i32) {
    %c0_i32 = arith.constant 0 : i32
    %c0_i32_0 = arith.constant 0 : i32
    return %arg0, %c0_i32 : i32, i32
  }
  func.func @transform_4(%arg0: i32) -> (i32, i32) {
    %c0_i32 = arith.constant 0 : i32
    %c0_i32_0 = arith.constant 0 : i32
    return %arg0, %c0_i32 : i32, i32
  }
  func.func @transform_5(%arg0: i32) -> (i32, i32) {
    %c0_i32 = arith.constant 0 : i32
    %c0_i32_0 = arith.constant 0 : i32
    return %arg0, %c0_i32 : i32, i32
  }
}

</mosaic_0001>

<bundles_post_ra>
// kernel: tpu_custom_call.1
= control target key start
LH: loop header
LB: loop body
LE: loop exit
PB: predicated region body
PF: predicated region fallthrough
CT: control target
= control target key end

     0   :  { %11 = vsyncpa [#allocation3], 0  ;;  %s278_s0 = inlined_call_operand.hbm [shape: f32[1,32], index: 0, kind: input, shape index: {}]   ;;  %s279_s1 = inlined_call_operand.vmem [shape: f32[1,32], index: 1, kind: input, shape index: {}]   ;;  %s280_s2 = inlined_call_operand.vmem [shape: f32[1,32], index: 2, kind: input, shape index: {}]   ;;  %s281_s3 = inlined_call_operand.hbm [shape: f32[1,32], index: 3, kind: output, shape index: {0}]   ;;  %s282_s4 = inlined_call_operand.hbm [shape: f32[1,32], index: 4, kind: output, shape index: {1}]   ;;  %s283_s5 = inlined_call_operand.hbm [shape: f32[1,32], index: 5, kind: output, shape index: {2}]  }
   0x1   :  { %12 = vsyncpa [#allocation4], 0 }
   0x2   :  { %13 = vsyncpa [#allocation7], 0  ;;  %s187_s18 = smov [#allocation2]   ;;  %s93_s22 = scalar_lea.hbm %s278_s0, 16 }
   0x3   :  { %s20_s19 = sshll.u32 %s187_s18, 4  ;;  %p94_p0 = scmp.ne.s32.totalorder %s278_s0, %s93_s22  ;;  %s21_s19 = int_to_ptr.vmem [resolvable:$true] %s20_s19 }
   0x4   :  { %p97_p1 = scmp.lt.u32.totalorder %s93_s22, %s278_s0 }
   0x6   :  { %p99_p2 = pnand %p97_p1, %p94_p0 }
   0x8   :  { %102 = shalt.err (!%p99_p2)
}
   0x9   :  { %s103_s27 = scalar_lea.vmem %s21_s19, 16  ;;  %s107_s28 = scalar_lea.vmem %s21_s19, 32 }
   0xa   :  { %p104_p3 = scmp.ne.s32.totalorder %s21_s19, %s103_s27  ;;  %p108_p4 = scmp.lt.s32.totalorder %s21_s19, %s21_s19 }
   0xb   :  { %p109_p5 = scmp.lt.s32.totalorder %s107_s28, %s103_s27 }
   0xd   :  { %p110_p6 = por %p109_p5, %p108_p4 }
   0xf   :  { %p111_p7 = pnand %p110_p6, %p104_p3 }
  0x11   :  { %114 = shalt.err (!%p111_p7)
}
  0x12   :  { %23 = dma.hbm_to_vmem [thread:$0]  %s278_s0, 16, %s21_s19, [#allocation3]  }
  0x13   :  { %181 = dma.done.wait [#allocation3], 16  }
  0x14   :  { %182 = vsyncadd [#allocation3], 4294967280  ;;  %v31_v0 = vld [vmem:[%s279_s1] sm:$0x1]  ;;  %s188_s8 = smov [#allocation5]   ;;  %vm37_vm0 = vcmask 253952  }
  0x15   :  { %s51_s9 = sshll.u32 %s188_s8, 4  ;;  %v32_v1 = vmax.f32 %v31_v0, -30.0  ;;  %s52_s9 = int_to_ptr.vmem [resolvable:$true] %s51_s9 }
  0x16   :  { %s115_s10 = scalar_lea.vmem %s52_s9, 16  ;;  %s119_s11 = scalar_lea.vmem %s52_s9, 32 }
  0x17   :  { %v33_v2 = vmin.f32 %v32_v1, 20.0  ;;  %p116_p8 = scmp.ne.s32.totalorder %s52_s9, %s115_s10  ;;  %p120_p9 = scmp.lt.s32.totalorder %s52_s9, %s52_s9 }
  0x18   :  { %p121_p10 = scmp.lt.s32.totalorder %s119_s11, %s115_s10 }
  0x19   :  { %v34_v3 = vmul.f32 0.5, %v33_v2  ;;  %38 = vst.msk [vmem:[#allocation5] sm:$0x1] %vm37_vm0, %v33_v2 }
  0x1a   :  { %p122_p11 = por %p121_p10, %p120_p9 }
  0x1c   :  { %p123_p12 = pnand %p122_p11, %p116_p8 }
  0x1e   :  { %126 = shalt.err (!%p123_p12)
}
  0x1f   :  { %s127_s1 = scalar_lea.hbm %s281_s3, 16 }
  0x20   :  { %p128_p13 = scmp.ne.s32.totalorder %s281_s3, %s127_s1  ;;  %p131_p0 = scmp.lt.u32.totalorder %s127_s1, %s281_s3 }
  0x22   :  { %p133_p1 = pnand %p131_p0, %p128_p13 }
  0x24   :  { %136 = shalt.err (!%p133_p1)
}
  0x25   :  { %54 = dma.vmem_to_hbm [thread:$0]  %s52_s9, 16, %s281_s3, [#allocation4]   ;;  %v35_v4 = vmul.f32 1.442695, %v34_v3  ;;  %v41_v5 = vld [vmem:[%s280_s2] sm:$0x1] }
  0x26   :  { %s189_s19 = smov [#allocation6]   ;;  %v40_v7 = vld [vmem:[#allocation2] sm:$0x1]  ;;  %s190_s23 = smov [#allocation8]  }
  0x27   :  { %91 = vpow2.f32 %v35_v4  ;;  %s61_s20 = sshll.u32 %s189_s19, 4  ;;  %s71_s24 = sshll.u32 %s190_s23, 4  ;;  %s62_s20 = int_to_ptr.vmem [resolvable:$true] %s61_s20  ;;  %s72_s24 = int_to_ptr.vmem [resolvable:$true] %s71_s24 }
  0x28   :  { %s137_s25 = scalar_lea.vmem %s62_s20, 16  ;;  %s141_s26 = scalar_lea.vmem %s62_s20, 32 }
  0x29   :  { %p138_p2 = scmp.ne.s32.totalorder %s62_s20, %s137_s25  ;;  %p142_p3 = scmp.lt.s32.totalorder %s62_s20, %s62_s20 }
  0x2a   :  { %p143_p4 = scmp.lt.s32.totalorder %s141_s26, %s137_s25 }
  0x2c   :  { %p144_p5 = por %p143_p4, %p142_p3 }
  0x2e   :  { %p145_p6 = pnand %p144_p5, %p138_p2 }
  0x31   :  { %v92_v6 = vpop.eup %91 }
  0x32   :  { %39 = vst.msk [vmem:[#allocation6] sm:$0x1] %vm37_vm0, %v92_v6  ;;  %v42_v8 = vmul.f32 %v92_v6, %v41_v5 }
  0x33   :  { %148 = shalt.err (!%p145_p6)
}
  0x34   :  { %s149_s2 = scalar_lea.hbm %s282_s4, 16 }
  0x35   :  { %p150_p7 = scmp.ne.s32.totalorder %s282_s4, %s149_s2  ;;  %p153_p8 = scmp.lt.u32.totalorder %s149_s2, %s282_s4 }
  0x37   :  { %p155_p9 = pnand %p153_p8, %p150_p7 }
  0x39   :  { %158 = shalt.err (!%p155_p9)
}
  0x3a   :  { %64 = dma.vmem_to_hbm [thread:$0]  %s62_s20, 16, %s282_s4, [#allocation7]   ;;  %v43_v9 = vadd.f32 %v42_v8, %v40_v7 }
  0x3b   :  { %s159_s9 = scalar_lea.vmem %s72_s24, 16  ;;  %s163_s10 = scalar_lea.vmem %s72_s24, 32 }
  0x3c   :  { %44 = vst.msk [vmem:[#allocation8] sm:$0x1] %vm37_vm0, %v43_v9  ;;  %p160_p10 = scmp.ne.s32.totalorder %s72_s24, %s159_s9  ;;  %p164_p11 = scmp.lt.s32.totalorder %s72_s24, %s72_s24 }
  0x3d   :  { %p165_p12 = scmp.lt.s32.totalorder %s163_s10, %s159_s9 }
  0x3f   :  { %p166_p13 = por %p165_p12, %p164_p11 }
  0x41   :  { %p167_p0 = pnand %p166_p13, %p160_p10 }
  0x43   :  { %170 = shalt.err (!%p167_p0)
}
  0x44   :  { %s171_s12 = scalar_lea.hbm %s283_s5, 16 }
  0x45   :  { %p172_p1 = scmp.ne.s32.totalorder %s283_s5, %s171_s12  ;;  %p175_p2 = scmp.lt.u32.totalorder %s171_s12, %s283_s5 }
  0x47   :  { %p177_p3 = pnand %p175_p2, %p172_p1 }
  0x49   :  { %180 = shalt.err (!%p177_p3)
}
  0x4a   :  { %74 = dma.vmem_to_hbm [thread:$0]  %s72_s24, 16, %s283_s5, [#allocation7]  }
  0x4b   :  { %183 = dma.done.wait [#allocation4], 16  }
  0x4c   :  { %184 = vsyncadd [#allocation4], 4294967280 }
  0x4d   :  { %185 = dma.done.wait [#allocation7], 32  }
  0x4e   :  { %186 = vsyncadd [#allocation7], 4294967264 }
  0x4f   :  { %84 = vsyncpa [#allocation3], 1 }
  0x50   :  { %85 = vsyncpa [#allocation4], 1 }
  0x51   :  { %86 = vsyncpa [#allocation7], 1 }

</bundles_post_ra>
